<compile_context>
chip_gen: v7x
topology: tpu7x:2x2x1
jax: 0.10.0
libtpu: 0.0.40
codegen_flags: <defaults>
</compile_context>

<pallas_src>
import jax
import jax.numpy as jnp
from jax.experimental import pallas as pl
from jax.experimental.pallas import tpu as pltpu

_EPS = 1e-5


# ----------------------------- Pallas kernels -------------------------------

def _conv_stats_kernel(p_ref, w_ref, b_ref, y_ref, s_ref):
    """y = patches @ w + bias (bf16 x bf16 -> f32 on MXU); also emits the
    per-tile (sum, sum-of-squares) partials needed for two-pass BatchNorm."""
    y = jnp.dot(p_ref[...], w_ref[...], preferred_element_type=jnp.float32)
    y = y + b_ref[...]
    y_ref[...] = y
    ssum = jnp.sum(y, axis=0, keepdims=True)          # (1, Cout)
    ssq = jnp.sum(y * y, axis=0, keepdims=True)       # (1, Cout)
    s_ref[...] = jnp.concatenate([ssum, ssq], axis=0)[None, :, :]   # (1, 2, Cout)


def _bn_relu_kernel(y_ref, sc_ref, sh_ref, o_ref):
    """out = relu(y * scale + shift)   (BatchNorm folded into scale/shift)."""
    o_ref[...] = jnp.maximum(y_ref[...] * sc_ref[...] + sh_ref[...], 0.0)


def _bn_add_relu_kernel(y_ref, sc_ref, sh_ref, r_ref, rsc_ref, rsh_ref, o_ref):
    """out = relu( relu(y*scale+shift) + (res*res_scale + res_shift) )
    == PyTorch: out = relu(bn2(conv2)); out += residual; out = relu(out)."""
    main = jnp.maximum(y_ref[...] * sc_ref[...] + sh_ref[...], 0.0)
    res = r_ref[...] * rsc_ref[...] + rsh_ref[...]
    o_ref[...] = jnp.maximum(main + res, 0.0)


# --------------------------- pallas_call wrappers ----------------------------

def _row_tile(P, target):
    """Largest multiple-of-8 tile <= target that divides P (fallback: full P)."""
    if P <= target:
        return P
    t = target - (target % 8)
    while t >= 8:
        if P % t == 0:
            return t
        t -= 8
    return P


def _conv_bias_stats(patches_bf16, w_bf16, bias_f32, *, row_tile):
    P, K = patches_bf16.shape
    Cout = w_bf16.shape[-1]
    nt = P // row_tile
    y, stats = pl.pallas_call(
        _conv_stats_kernel,
        out_shape=(jax.ShapeDtypeStruct((P, Cout), jnp.float32),
                   jax.ShapeDtypeStruct((nt, 2, Cout), jnp.float32)),
        grid=(nt,),
        in_specs=[
            pl.BlockSpec((row_tile, K), lambda i: (i, 0)),   # streamed row tiles
            pl.BlockSpec((K, Cout), lambda i: (0, 0)),        # VMEM-resident weight
            pl.BlockSpec((1, Cout), lambda i: (0, 0)),        # VMEM-resident bias
        ],
        out_specs=(
            pl.BlockSpec((row_tile, Cout), lambda i: (i, 0)),
            pl.BlockSpec((1, 2, Cout), lambda i: (i, 0, 0)),
        ),
        compiler_params=pltpu.CompilerParams(
            dimension_semantics=("parallel",)),
    )(patches_bf16, w_bf16, bias_f32)
    return y, stats


def _bn_relu(y, scale, shift, *, row_tile):
    P, C = y.shape
    nt = P // row_tile
    return pl.pallas_call(
        _bn_relu_kernel,
        out_shape=jax.ShapeDtypeStruct((P, C), jnp.float32),
        grid=(nt,),
        in_specs=[
            pl.BlockSpec((row_tile, C), lambda i: (i, 0)),
            pl.BlockSpec((1, C), lambda i: (0, 0)),
            pl.BlockSpec((1, C), lambda i: (0, 0)),
        ],
        out_specs=pl.BlockSpec((row_tile, C), lambda i: (i, 0)),
        compiler_params=pltpu.CompilerParams(
            dimension_semantics=("parallel",)),
    )(y, scale, shift)


def _bn_add_relu(y, scale, shift, res, res_scale, res_shift, *, row_tile):
    P, C = y.shape
    nt = P // row_tile
    return pl.pallas_call(
        _bn_add_relu_kernel,
        out_shape=jax.ShapeDtypeStruct((P, C), jnp.float32),
        grid=(nt,),
        in_specs=[
            pl.BlockSpec((row_tile, C), lambda i: (i, 0)),
            pl.BlockSpec((1, C), lambda i: (0, 0)),
            pl.BlockSpec((1, C), lambda i: (0, 0)),
            pl.BlockSpec((row_tile, C), lambda i: (i, 0)),
            pl.BlockSpec((1, C), lambda i: (0, 0)),
            pl.BlockSpec((1, C), lambda i: (0, 0)),
        ],
        out_specs=pl.BlockSpec((row_tile, C), lambda i: (i, 0)),
        compiler_params=pltpu.CompilerParams(
            dimension_semantics=("parallel",)),
    )(y, scale, shift, res, res_scale, res_shift)


# ------------------------------- JAX glue ------------------------------------

def _im2col_3x3(x_nhwc, stride):
    """3x3/pad=1 shifted taps concatenated along channels -> (P, 9*C), matching the
    (kh, kw, cin) flattening of the HWIO weight reshape.
    # TODO(synk): generate taps in-kernel via halo DMA (and fuse conv1->conv2) to
    # remove the 9x im2col HBM expansion; kept as wrapper glue here.
    """
    N, H, W, C = x_nhwc.shape
    xp = jnp.pad(x_nhwc, ((0, 0), (1, 1), (1, 1), (0, 0)))
    Ho = (H + 2 - 3) // stride + 1
    Wo = (W + 2 - 3) // stride + 1
    taps = []
    for dy in range(3):
        for dx in range(3):
            taps.append(xp[:, dy:dy + (Ho - 1) * stride + 1:stride,
                              dx:dx + (Wo - 1) * stride + 1:stride, :])
    patches = jnp.concatenate(taps, axis=-1)          # (N, Ho, Wo, 9*C)
    return patches.reshape(N * Ho * Wo, 9 * C), Ho, Wo


def _bn_fold(stats, count, gamma, beta):
    """Fold per-tile (sum, sumsq) partials into per-channel (scale, shift) so the
    elementwise kernels apply BN as y*scale + shift (training-mode batch stats)."""
    ssum = jnp.sum(stats[:, 0, :], axis=0)
    ssq = jnp.sum(stats[:, 1, :], axis=0)
    mean = ssum / count
    var = jnp.maximum(ssq / count - mean * mean, 0.0)
    scale = gamma * jax.lax.rsqrt(var + _EPS)
    shift = beta - mean * scale
    return (scale.reshape(1, -1).astype(jnp.float32),
            shift.reshape(1, -1).astype(jnp.float32))


def bottleneck_forward(x_nchw, params, *, stride, has_side, row_tile_target=512):
    """Forward pass of the PyTorch Bottleneck block (NCHW in / NCHW out)."""
    x = jnp.transpose(x_nchw, (0, 2, 3, 1)).astype(jnp.float32)   # NHWC
    N, H, W, Cin = x.shape
    Cout = params["w1"].shape[-1]

    # ---- conv1 (3x3, stride, pad=1, bias) + bn1(train) + relu ----
    patches1, Ho, Wo = _im2col_3x3(x, stride)
    P = patches1.shape[0]
    rt = _row_tile(P, row_tile_target)
    y1, st1 = _conv_bias_stats(
        patches1.astype(jnp.bfloat16),
        params["w1"].reshape(9 * Cin, Cout).astype(jnp.bfloat16),
        params["b1"].reshape(1, Cout).astype(jnp.float32),
        row_tile=rt)
    sc1, sh1 = _bn_fold(st1, P, params["bn1_g"], params["bn1_b"])
    out1 = _bn_relu(y1, sc1, sh1, row_tile=rt)                    # (P, Cout) f32

    # ---- residual branch ----
    if has_side:
        # side = Conv2d(1x1, stride, bias=False) + BatchNorm2d; the side BN is
        # folded into the final fused kernel via (res_scale, res_shift).
        x_sub = x[:, ::stride, ::stride, :]
        yr, str_ = _conv_bias_stats(
            x_sub.reshape(P, Cin).astype(jnp.bfloat16),
            params["ws"].reshape(Cin, Cout).astype(jnp.bfloat16),
            jnp.zeros((1, Cout), jnp.float32),
            row_tile=rt)
        rsc, rsh = _bn_fold(str_, P, params["bns_g"], params["bns_b"])
        res = yr
    else:
        # identity residual (requires Cin == Cout and stride == 1, as in PyTorch)
        res = x.reshape(P, Cin)
        rsc = jnp.ones((1, Cout), jnp.float32)
        rsh = jnp.zeros((1, Cout), jnp.float32)

    # ---- conv2 (3x3, s=1, pad=1, bias) + bn2 + relu, then +residual, relu ----
    patches2, Ho2, Wo2 = _im2col_3x3(out1.reshape(N, Ho, Wo, Cout), 1)
    y2, st2 = _conv_bias_stats(
        patches2.astype(jnp.bfloat16),
        params["w2"].reshape(9 * Cout, Cout).astype(jnp.bfloat16),
        params["b2"].reshape(1, Cout).astype(jnp.float32),
        row_tile=rt)
    sc2, sh2 = _bn_fold(st2, P, params["bn2_g"], params["bn2_b"])
    out2 = _bn_add_relu(y2, sc2, sh2, res, rsc, rsh, row_tile=rt)

    return jnp.transpose(out2.reshape(N, Ho2, Wo2, Cout), (0, 3, 1, 2))   # NCHW


# --------------------- deterministic parameter init --------------------------

def init_bottleneck_params(key, in_ch, out_ch, with_side):
    ks = jax.random.split(key, 12)
    p = {
        # conv weights stored HWIO: (kh, kw, Cin, Cout)
        "w1": 0.1 * jax.random.normal(ks[0], (3, 3, in_ch, out_ch), jnp.float32),
        "b1": 0.1 * jax.random.normal(ks[1], (out_ch,), jnp.float32),
        "bn1_g": 1.0 + 0.1 * jax.random.normal(ks[2], (out_ch,), jnp.float32),
        "bn1_b": 0.1 * jax.random.normal(ks[3], (out_ch,), jnp.float32),
        "w2": 0.1 * jax.random.normal(ks[4], (3, 3, out_ch, out_ch), jnp.float32),
        "b2": 0.1 * jax.random.normal(ks[5], (out_ch,), jnp.float32),
        "bn2_g": 1.0 + 0.1 * jax.random.normal(ks[6], (out_ch,), jnp.float32),
        "bn2_b": 0.1 * jax.random.normal(ks[7], (out_ch,), jnp.float32),
    }
    if with_side:
        p["ws"] = 0.1 * jax.random.normal(ks[8], (1, 1, in_ch, out_ch), jnp.float32)
        p["bns_g"] = 1.0 + 0.1 * jax.random.normal(ks[9], (out_ch,), jnp.float32)
        p["bns_b"] = 0.1 * jax.random.normal(ks[10], (out_ch,), jnp.float32)
    return p


# ------------------------- pure-JAX reference ---------------------------------

def _ref_conv(x_nchw, w_hwio, stride, pad, bias=None, *, matmul_dtype=jnp.float32,
              precision=None):
    w = jnp.transpose(w_hwio, (3, 2, 0, 1)).astype(matmul_dtype)   # OIHW
    y = jax.lax.conv_general_dilated(
        x_nchw.astype(matmul_dtype), w, (stride, stride), [(pad, pad), (pad, pad)],
        dimension_numbers=("NCHW", "OIHW", "NCHW"),
        preferred_element_type=jnp.float32, precision=precision)
    if bias is not None:
        y = y + bias.reshape(1, -1, 1, 1)
    return y


def _ref_bn_train(x_nchw, g, b):
    mean = jnp.mean(x_nchw, axis=(0, 2, 3), keepdims=True)
    var = jnp.var(x_nchw, axis=(0, 2, 3), keepdims=True)
    return ((x_nchw - mean) / jnp.sqrt(var + _EPS)) * g.reshape(1, -1, 1, 1) \
           + b.reshape(1, -1, 1, 1)


def ref_bottleneck(x_nchw, p, *, stride, has_side, matmul_dtype=jnp.float32,
                   precision=None):
    out = jax.nn.relu(_ref_bn_train(
        _ref_conv(x_nchw, p["w1"], stride, 1, p["b1"],
                  matmul_dtype=matmul_dtype, precision=precision),
        p["bn1_g"], p["bn1_b"]))
    out = jax.nn.relu(_ref_bn_train(
        _ref_conv(out, p["w2"], 1, 1, p["b2"],
                  matmul_dtype=matmul_dtype, precision=precision),
        p["bn2_g"], p["bn2_b"]))
    if has_side:
        residual = _ref_bn_train(
            _ref_conv(x_nchw, p["ws"], stride, 0, None,
                      matmul_dtype=matmul_dtype, precision=precision),
            p["bns_g"], p["bns_b"])
    else:
        residual = x_nchw
    return jax.nn.relu(out + residual)


# --------------------------------- main ---------------------------------------

if __name__ == "__main__":
    key = jax.random.PRNGKey(0)
    k_x, k_p1, k_p2 = jax.random.split(key, 3)

    N, Cin, H, W = 2, 4, 16, 16
    Cout = 8   # Bottleneck.extention == 2 style widening

    x = jax.random.normal(k_x, (N, Cin, H, W), jnp.float32)

    # block1: stride=2 with side (downsample) branch; block2: stride=1, identity
    p1 = init_bottleneck_params(k_p1, Cin, Cout, with_side=True)
    p2 = init_bottleneck_params(k_p2, Cout, Cout, with_side=False)

    fwd = jax.jit(bottleneck_forward,
                  static_argnames=("stride", "has_side", "row_tile_target"))
    # row_tile_target=64 -> 2 row tiles per pallas_call at this toy size, exercising
    # the tiled/pipelined grid and the cross-tile BatchNorm partial-sum path.
    y1 = fwd(x, p1, stride=2, has_side=True, row_tile_target=64)
    y2 = fwd(y1, p2, stride=1, has_side=False, row_tile_target=64)
    y2 = jax.block_until_ready(y2)
    assert y2.shape == (N, Cout, H // 2, W // 2), y2.shape

    # Tight check vs. a reference in the same bf16-matmul / f32-accumulate regime.
    rb1 = ref_bottleneck(x, p1, stride=2, has_side=True, matmul_dtype=jnp.bfloat16)
    rb2 = ref_bottleneck(rb1, p2, stride=1, has_side=False, matmul_dtype=jnp.bfloat16)
    err_b = float(jnp.max(jnp.abs(y2 - rb2)))
    assert jnp.allclose(y2, rb2, atol=3e-2, rtol=3e-2), err_b

    # Loose sanity check vs. the full-f32 reference (matmul inputs are bf16 by design).
    rf1 = ref_bottleneck(x, p1, stride=2, has_side=True,
                         matmul_dtype=jnp.float32, precision=jax.lax.Precision.HIGHEST)
    rf2 = ref_bottleneck(rf1, p2, stride=1, has_side=False,
                         matmul_dtype=jnp.float32, precision=jax.lax.Precision.HIGHEST)
    err_f = float(jnp.max(jnp.abs(y2 - rf2)))
    assert jnp.allclose(y2, rf2, atol=2.5e-1, rtol=1e-1), err_f

    print("KERNEL_OK")
</pallas_src>

<mosaic_0001>
module attributes {stable_mosaic.version = 11 : i64} {
  func.func @_conv_stats_kernel(%arg0: i32, %arg1: memref<64x4xbf16, #tpu.memory_space<vmem>>, %arg2: memref<4x8xbf16, #tpu.memory_space<vmem>>, %arg3: memref<1x8xf32, #tpu.memory_space<vmem>>, %arg4: memref<64x8xf32, #tpu.memory_space<vmem>>, %arg5: memref<1x2x8xf32, #tpu.memory_space<vmem>>) attributes {dimension_semantics = [#tpu.dimension_semantics<parallel>], iteration_bounds = array<i64: 2>, scalar_prefetch = 0 : i64, scratch_operands = 0 : i64, tpu.core_type = #tpu.core_type<tc>, window_params = [{transform_indices = @transform_0, window_bounds = array<i64: 64, 4>}, {pipeline_mode = #tpu.pipeline_mode<synchronous>, transform_indices = @transform_1, window_bounds = array<i64: 4, 8>}, {pipeline_mode = #tpu.pipeline_mode<synchronous>, transform_indices = @transform_2, window_bounds = array<i64: 1, 8>}, {transform_indices = @transform_3, window_bounds = array<i64: 64, 8>}, {transform_indices = @transform_4, window_bounds = array<i64: 1, 2, 8>}]} {
    %c0 = arith.constant 0 : index
    %c0_0 = arith.constant 0 : index
    %0 = vector.load %arg1[%c0, %c0_0] : memref<64x4xbf16, #tpu.memory_space<vmem>>, vector<64x4xbf16>
    %c0_1 = arith.constant 0 : index
    %c0_2 = arith.constant 0 : index
    %1 = vector.load %arg2[%c0_1, %c0_2] : memref<4x8xbf16, #tpu.memory_space<vmem>>, vector<4x8xbf16>
    %cst = arith.constant dense<0.000000e+00> : vector<64x8xf32>
    %2 = tpu.matmul %0, %1, %cst {dimension_numbers = #tpu.dot_dimension_numbers<[1], [0], [0], [1], [0, 0, 1, 1], [], []>} : vector<64x4xbf16>, vector<4x8xbf16>, vector<64x8xf32> -> vector<64x8xf32>
    %c0_3 = arith.constant 0 : index
    %c0_4 = arith.constant 0 : index
    %3 = vector.load %arg3[%c0_3, %c0_4] : memref<1x8xf32, #tpu.memory_space<vmem>>, vector<1x8xf32>
    %4 = vector.broadcast %3 : vector<1x8xf32> to vector<64x8xf32>
    %5 = arith.addf %2, %4 : vector<64x8xf32>
    %c0_5 = arith.constant 0 : index
    %c0_6 = arith.constant 0 : index
    %6 = vector.load %arg4[%c0_5, %c0_6] : memref<64x8xf32, #tpu.memory_space<vmem>>, vector<64x8xf32>
    tpu.vector_store %arg4[%c0_5, %c0_6], %5 {strides = array<i32>} : memref<64x8xf32, #tpu.memory_space<vmem>>, vector<64x8xf32>,
    %cst_7 = arith.constant dense<0.000000e+00> : vector<8xf32>
    %7 = vector.multi_reduction <add>, %5, %cst_7 [0] : vector<64x8xf32> to vector<8xf32>
    %8 = vector.shape_cast %7 : vector<8xf32> to vector<1x8xf32>
    %9 = arith.mulf %5, %5 : vector<64x8xf32>
    %cst_8 = arith.constant dense<0.000000e+00> : vector<8xf32>
    %10 = vector.multi_reduction <add>, %9, %cst_8 [0] : vector<64x8xf32> to vector<8xf32>
    %11 = vector.shape_cast %10 : vector<8xf32> to vector<1x8xf32>
    %12 = tpu.concatenate %8, %11 in 0 : vector<1x8xf32>, vector<1x8xf32> -> vector<2x8xf32>
    %13 = vector.shape_cast %12 : vector<2x8xf32> to vector<1x2x8xf32>
    %c0_9 = arith.constant 0 : index
    %c0_10 = arith.constant 0 : index
    %c0_11 = arith.constant 0 : index
    %14 = vector.load %arg5[%c0_9, %c0_10, %c0_11] : memref<1x2x8xf32, #tpu.memory_space<vmem>>, vector<1x2x8xf32>
    tpu.vector_store %arg5[%c0_9, %c0_10, %c0_11], %13 {strides = array<i32>} : memref<1x2x8xf32, #tpu.memory_space<vmem>>, vector<1x2x8xf32>,
    return
  }
  func.func @transform_0(%arg0: i32) -> (i32, i32) {
    %c0_i32 = arith.constant 0 : i32
    %c0_i32_0 = arith.constant 0 : i32
    return %arg0, %c0_i32 : i32, i32
  }
  func.func @transform_1(%arg0: i32) -> (i32, i32) {
    %c0_i32 = arith.constant 0 : i32
    %c0_i32_0 = arith.constant 0 : i32
    %c0_i32_1 = arith.constant 0 : i32
    return %c0_i32, %c0_i32_0 : i32, i32
  }
  func.func @transform_2(%arg0: i32) -> (i32, i32) {
    %c0_i32 = arith.constant 0 : i32
    %c0_i32_0 = arith.constant 0 : i32
    %c0_i32_1 = arith.constant 0 : i32
    return %c0_i32, %c0_i32_0 : i32, i32
  }
  func.func @transform_3(%arg0: i32) -> (i32, i32) {
    %c0_i32 = arith.constant 0 : i32
    %c0_i32_0 = arith.constant 0 : i32
    return %arg0, %c0_i32 : i32, i32
  }
  func.func @transform_4(%arg0: i32) -> (i32, i32, i32) {
    %c0_i32 = arith.constant 0 : i32
    %c0_i32_0 = arith.constant 0 : i32
    %c0_i32_1 = arith.constant 0 : i32
    return %arg0, %c0_i32, %c0_i32_0 : i32, i32, i32
  }
}

module attributes {stable_mosaic.version = 11 : i64} {
  func.func @_conv_stats_kernel(%arg0: i32, %arg1: memref<64x36xbf16, #tpu.memory_space<vmem>>, %arg2: memref<36x8xbf16, #tpu.memory_space<vmem>>, %arg3: memref<1x8xf32, #tpu.memory_space<vmem>>, %arg4: memref<64x8xf32, #tpu.memory_space<vmem>>, %arg5: memref<1x2x8xf32, #tpu.memory_space<vmem>>) attributes {dimension_semantics = [#tpu.dimension_semantics<parallel>], iteration_bounds = array<i64: 2>, scalar_prefetch = 0 : i64, scratch_operands = 0 : i64, tpu.core_type = #tpu.core_type<tc>, window_params = [{transform_indices = @transform_0, window_bounds = array<i64: 64, 36>}, {pipeline_mode = #tpu.pipeline_mode<synchronous>, transform_indices = @transform_1, window_bounds = array<i64: 36, 8>}, {pipeline_mode = #tpu.pipeline_mode<synchronous>, transform_indices = @transform_2, window_bounds = array<i64: 1, 8>}, {transform_indices = @transform_3, window_bounds = array<i64: 64, 8>}, {transform_indices = @transform_4, window_bounds = array<i64: 1, 2, 8>}]} {
    %c0 = arith.constant 0 : index
    %c0_0 = arith.constant 0 : index
    %0 = vector.load %arg1[%c0, %c0_0] : memref<64x36xbf16, #tpu.memory_space<vmem>>, vector<64x36xbf16>
    %c0_1 = arith.constant 0 : index
    %c0_2 = arith.constant 0 : index
    %1 = vector.load %arg2[%c0_1, %c0_2] : memref<36x8xbf16, #tpu.memory_space<vmem>>, vector<36x8xbf16>
    %cst = arith.constant dense<0.000000e+00> : vector<64x8xf32>
    %2 = tpu.matmul %0, %1, %cst {dimension_numbers = #tpu.dot_dimension_numbers<[1], [0], [0], [1], [0, 0, 1, 1], [], []>} : vector<64x36xbf16>, vector<36x8xbf16>, vector<64x8xf32> -> vector<64x8xf32>
    %c0_3 = arith.constant 0 : index
    %c0_4 = arith.constant 0 : index
    %3 = vector.load %arg3[%c0_3, %c0_4] : memref<1x8xf32, #tpu.memory_space<vmem>>, vector<1x8xf32>
    %4 = vector.broadcast %3 : vector<1x8xf32> to vector<64x8xf32>
    %5 = arith.addf %2, %4 : vector<64x8xf32>
    %c0_5 = arith.constant 0 : index
    %c0_6 = arith.constant 0 : index
    %6 = vector.load %arg4[%c0_5, %c0_6] : memref<64x8xf32, #tpu.memory_space<vmem>>, vector<64x8xf32>
    tpu.vector_store %arg4[%c0_5, %c0_6], %5 {strides = array<i32>} : memref<64x8xf32, #tpu.memory_space<vmem>>, vector<64x8xf32>,
    %cst_7 = arith.constant dense<0.000000e+00> : vector<8xf32>
    %7 = vector.multi_reduction <add>, %5, %cst_7 [0] : vector<64x8xf32> to vector<8xf32>
    %8 = vector.shape_cast %7 : vector<8xf32> to vector<1x8xf32>
    %9 = arith.mulf %5, %5 : vector<64x8xf32>
    %cst_8 = arith.constant dense<0.000000e+00> : vector<8xf32>
    %10 = vector.multi_reduction <add>, %9, %cst_8 [0] : vector<64x8xf32> to vector<8xf32>
    %11 = vector.shape_cast %10 : vector<8xf32> to vector<1x8xf32>
    %12 = tpu.concatenate %8, %11 in 0 : vector<1x8xf32>, vector<1x8xf32> -> vector<2x8xf32>
    %13 = vector.shape_cast %12 : vector<2x8xf32> to vector<1x2x8xf32>
    %c0_9 = arith.constant 0 : index
    %c0_10 = arith.constant 0 : index
    %c0_11 = arith.constant 0 : index
    %14 = vector.load %arg5[%c0_9, %c0_10, %c0_11] : memref<1x2x8xf32, #tpu.memory_space<vmem>>, vector<1x2x8xf32>
    tpu.vector_store %arg5[%c0_9, %c0_10, %c0_11], %13 {strides = array<i32>} : memref<1x2x8xf32, #tpu.memory_space<vmem>>, vector<1x2x8xf32>,
    return
  }
  func.func @transform_0(%arg0: i32) -> (i32, i32) {
    %c0_i32 = arith.constant 0 : i32
    %c0_i32_0 = arith.constant 0 : i32
    return %arg0, %c0_i32 : i32, i32
  }
  func.func @transform_1(%arg0: i32) -> (i32, i32) {
    %c0_i32 = arith.constant 0 : i32
    %c0_i32_0 = arith.constant 0 : i32
    %c0_i32_1 = arith.constant 0 : i32
    return %c0_i32, %c0_i32_0 : i32, i32
  }
  func.func @transform_2(%arg0: i32) -> (i32, i32) {
    %c0_i32 = arith.constant 0 : i32
    %c0_i32_0 = arith.constant 0 : i32
    %c0_i32_1 = arith.constant 0 : i32
    return %c0_i32, %c0_i32_0 : i32, i32
  }
  func.func @transform_3(%arg0: i32) -> (i32, i32) {
    %c0_i32 = arith.constant 0 : i32
    %c0_i32_0 = arith.constant 0 : i32
    return %arg0, %c0_i32 : i32, i32
  }
  func.func @transform_4(%arg0: i32) -> (i32, i32, i32) {
    %c0_i32 = arith.constant 0 : i32
    %c0_i32_0 = arith.constant 0 : i32
    %c0_i32_1 = arith.constant 0 : i32
    return %arg0, %c0_i32, %c0_i32_0 : i32, i32, i32
  }
}

module attributes {stable_mosaic.version = 11 : i64} {
  func.func @_bn_relu_kernel(%arg0: i32, %arg1: memref<64x8xf32, #tpu.memory_space<vmem>>, %arg2: memref<1x8xf32, #tpu.memory_space<vmem>>, %arg3: memref<1x8xf32, #tpu.memory_space<vmem>>, %arg4: memref<64x8xf32, #tpu.memory_space<vmem>>) attributes {dimension_semantics = [#tpu.dimension_semantics<parallel>], iteration_bounds = array<i64: 2>, scalar_prefetch = 0 : i64, scratch_operands = 0 : i64, tpu.core_type = #tpu.core_type<tc>, window_params = [{transform_indices = @transform_0, window_bounds = array<i64: 64, 8>}, {pipeline_mode = #tpu.pipeline_mode<synchronous>, transform_indices = @transform_1, window_bounds = array<i64: 1, 8>}, {pipeline_mode = #tpu.pipeline_mode<synchronous>, transform_indices = @transform_2, window_bounds = array<i64: 1, 8>}, {transform_indices = @transform_3, window_bounds = array<i64: 64, 8>}]} {
    %c0 = arith.constant 0 : index
    %c0_0 = arith.constant 0 : index
    %0 = vector.load %arg1[%c0, %c0_0] : memref<64x8xf32, #tpu.memory_space<vmem>>, vector<64x8xf32>
    %c0_1 = arith.constant 0 : index
    %c0_2 = arith.constant 0 : index
    %1 = vector.load %arg2[%c0_1, %c0_2] : memref<1x8xf32, #tpu.memory_space<vmem>>, vector<1x8xf32>
    %2 = vector.broadcast %1 : vector<1x8xf32> to vector<64x8xf32>
    %3 = arith.mulf %0, %2 : vector<64x8xf32>
    %c0_3 = arith.constant 0 : index
    %c0_4 = arith.constant 0 : index
    %4 = vector.load %arg3[%c0_3, %c0_4] : memref<1x8xf32, #tpu.memory_space<vmem>>, vector<1x8xf32>
    %5 = vector.broadcast %4 : vector<1x8xf32> to vector<64x8xf32>
    %6 = arith.addf %3, %5 : vector<64x8xf32>
    %cst = arith.constant 0.000000e+00 : f32
    %7 = vector.broadcast %cst : f32 to vector<64x8xf32>
    %8 = arith.maximumf %6, %7 : vector<64x8xf32>
    %c0_5 = arith.constant 0 : index
    %c0_6 = arith.constant 0 : index
    %9 = vector.load %arg4[%c0_5, %c0_6] : memref<64x8xf32, #tpu.memory_space<vmem>>, vector<64x8xf32>
    tpu.vector_store %arg4[%c0_5, %c0_6], %8 {strides = array<i32>} : memref<64x8xf32, #tpu.memory_space<vmem>>, vector<64x8xf32>,
    return
  }
  func.func @transform_0(%arg0: i32) -> (i32, i32) {
    %c0_i32 = arith.constant 0 : i32
    %c0_i32_0 = arith.constant 0 : i32
    return %arg0, %c0_i32 : i32, i32
  }
  func.func @transform_1(%arg0: i32) -> (i32, i32) {
    %c0_i32 = arith.constant 0 : i32
    %c0_i32_0 = arith.constant 0 : i32
    %c0_i32_1 = arith.constant 0 : i32
    return %c0_i32, %c0_i32_0 : i32, i32
  }
  func.func @transform_2(%arg0: i32) -> (i32, i32) {
    %c0_i32 = arith.constant 0 : i32
    %c0_i32_0 = arith.constant 0 : i32
    %c0_i32_1 = arith.constant 0 : i32
    return %c0_i32, %c0_i32_0 : i32, i32
  }
  func.func @transform_3(%arg0: i32) -> (i32, i32) {
    %c0_i32 = arith.constant 0 : i32
    %c0_i32_0 = arith.constant 0 : i32
    return %arg0, %c0_i32 : i32, i32
  }
}

module attributes {stable_mosaic.version = 11 : i64} {
  func.func @_conv_stats_kernel(%arg0: i32, %arg1: memref<64x72xbf16, #tpu.memory_space<vmem>>, %arg2: memref<72x8xbf16, #tpu.memory_space<vmem>>, %arg3: memref<1x8xf32, #tpu.memory_space<vmem>>, %arg4: memref<64x8xf32, #tpu.memory_space<vmem>>, %arg5: memref<1x2x8xf32, #tpu.memory_space<vmem>>) attributes {dimension_semantics = [#tpu.dimension_semantics<parallel>], iteration_bounds = array<i64: 2>, scalar_prefetch = 0 : i64, scratch_operands = 0 : i64, tpu.core_type = #tpu.core_type<tc>, window_params = [{transform_indices = @transform_0, window_bounds = array<i64: 64, 72>}, {pipeline_mode = #tpu.pipeline_mode<synchronous>, transform_indices = @transform_1, window_bounds = array<i64: 72, 8>}, {pipeline_mode = #tpu.pipeline_mode<synchronous>, transform_indices = @transform_2, window_bounds = array<i64: 1, 8>}, {transform_indices = @transform_3, window_bounds = array<i64: 64, 8>}, {transform_indices = @transform_4, window_bounds = array<i64: 1, 2, 8>}]} {
    %c0 = arith.constant 0 : index
    %c0_0 = arith.constant 0 : index
    %0 = vector.load %arg1[%c0, %c0_0] : memref<64x72xbf16, #tpu.memory_space<vmem>>, vector<64x72xbf16>
    %c0_1 = arith.constant 0 : index
    %c0_2 = arith.constant 0 : index
    %1 = vector.load %arg2[%c0_1, %c0_2] : memref<72x8xbf16, #tpu.memory_space<vmem>>, vector<72x8xbf16>
    %cst = arith.constant dense<0.000000e+00> : vector<64x8xf32>
    %2 = tpu.matmul %0, %1, %cst {dimension_numbers = #tpu.dot_dimension_numbers<[1], [0], [0], [1], [0, 0, 1, 1], [], []>} : vector<64x72xbf16>, vector<72x8xbf16>, vector<64x8xf32> -> vector<64x8xf32>
    %c0_3 = arith.constant 0 : index
    %c0_4 = arith.constant 0 : index
    %3 = vector.load %arg3[%c0_3, %c0_4] : memref<1x8xf32, #tpu.memory_space<vmem>>, vector<1x8xf32>
    %4 = vector.broadcast %3 : vector<1x8xf32> to vector<64x8xf32>
    %5 = arith.addf %2, %4 : vector<64x8xf32>
    %c0_5 = arith.constant 0 : index
    %c0_6 = arith.constant 0 : index
    %6 = vector.load %arg4[%c0_5, %c0_6] : memref<64x8xf32, #tpu.memory_space<vmem>>, vector<64x8xf32>
    tpu.vector_store %arg4[%c0_5, %c0_6], %5 {strides = array<i32>} : memref<64x8xf32, #tpu.memory_space<vmem>>, vector<64x8xf32>,
    %cst_7 = arith.constant dense<0.000000e+00> : vector<8xf32>
    %7 = vector.multi_reduction <add>, %5, %cst_7 [0] : vector<64x8xf32> to vector<8xf32>
    %8 = vector.shape_cast %7 : vector<8xf32> to vector<1x8xf32>
    %9 = arith.mulf %5, %5 : vector<64x8xf32>
    %cst_8 = arith.constant dense<0.000000e+00> : vector<8xf32>
    %10 = vector.multi_reduction <add>, %9, %cst_8 [0] : vector<64x8xf32> to vector<8xf32>
    %11 = vector.shape_cast %10 : vector<8xf32> to vector<1x8xf32>
    %12 = tpu.concatenate %8, %11 in 0 : vector<1x8xf32>, vector<1x8xf32> -> vector<2x8xf32>
    %13 = vector.shape_cast %12 : vector<2x8xf32> to vector<1x2x8xf32>
    %c0_9 = arith.constant 0 : index
    %c0_10 = arith.constant 0 : index
    %c0_11 = arith.constant 0 : index
    %14 = vector.load %arg5[%c0_9, %c0_10, %c0_11] : memref<1x2x8xf32, #tpu.memory_space<vmem>>, vector<1x2x8xf32>
    tpu.vector_store %arg5[%c0_9, %c0_10, %c0_11], %13 {strides = array<i32>} : memref<1x2x8xf32, #tpu.memory_space<vmem>>, vector<1x2x8xf32>,
    return
  }
  func.func @transform_0(%arg0: i32) -> (i32, i32) {
    %c0_i32 = arith.constant 0 : i32
    %c0_i32_0 = arith.constant 0 : i32
    return %arg0, %c0_i32 : i32, i32
  }
  func.func @transform_1(%arg0: i32) -> (i32, i32) {
    %c0_i32 = arith.constant 0 : i32
    %c0_i32_0 = arith.constant 0 : i32
    %c0_i32_1 = arith.constant 0 : i32
    return %c0_i32, %c0_i32_0 : i32, i32
  }
  func.func @transform_2(%arg0: i32) -> (i32, i32) {
    %c0_i32 = arith.constant 0 : i32
    %c0_i32_0 = arith.constant 0 : i32
    %c0_i32_1 = arith.constant 0 : i32
    return %c0_i32, %c0_i32_0 : i32, i32
  }
  func.func @transform_3(%arg0: i32) -> (i32, i32) {
    %c0_i32 = arith.constant 0 : i32
    %c0_i32_0 = arith.constant 0 : i32
    return %arg0, %c0_i32 : i32, i32
  }
  func.func @transform_4(%arg0: i32) -> (i32, i32, i32) {
    %c0_i32 = arith.constant 0 : i32
    %c0_i32_0 = arith.constant 0 : i32
    %c0_i32_1 = arith.constant 0 : i32
    return %arg0, %c0_i32, %c0_i32_0 : i32, i32, i32
  }
}

module attributes {stable_mosaic.version = 11 : i64} {
  func.func @_bn_add_relu_kernel(%arg0: i32, %arg1: memref<64x8xf32, #tpu.memory_space<vmem>>, %arg2: memref<1x8xf32, #tpu.memory_space<vmem>>, %arg3: memref<1x8xf32, #tpu.memory_space<vmem>>, %arg4: memref<64x8xf32, #tpu.memory_space<vmem>>, %arg5: memref<1x8xf32, #tpu.memory_space<vmem>>, %arg6: memref<1x8xf32, #tpu.memory_space<vmem>>, %arg7: memref<64x8xf32, #tpu.memory_space<vmem>>) attributes {dimension_semantics = [#tpu.dimension_semantics<parallel>], iteration_bounds = array<i64: 2>, scalar_prefetch = 0 : i64, scratch_operands = 0 : i64, tpu.core_type = #tpu.core_type<tc>, window_params = [{transform_indices = @transform_0, window_bounds = array<i64: 64, 8>}, {pipeline_mode = #tpu.pipeline_mode<synchronous>, transform_indices = @transform_1, window_bounds = array<i64: 1, 8>}, {pipeline_mode = #tpu.pipeline_mode<synchronous>, transform_indices = @transform_2, window_bounds = array<i64: 1, 8>}, {transform_indices = @transform_3, window_bounds = array<i64: 64, 8>}, {pipeline_mode = #tpu.pipeline_mode<synchronous>, transform_indices = @transform_4, window_bounds = array<i64: 1, 8>}, {pipeline_mode = #tpu.pipeline_mode<synchronous>, transform_indices = @transform_5, window_bounds = array<i64: 1, 8>}, {transform_indices = @transform_6, window_bounds = array<i64: 64, 8>}]} {
    %c0 = arith.constant 0 : index
    %c0_0 = arith.constant 0 : index
    %0 = vector.load %arg1[%c0, %c0_0] : memref<64x8xf32, #tpu.memory_space<vmem>>, vector<64x8xf32>
    %c0_1 = arith.constant 0 : index
    %c0_2 = arith.constant 0 : index
    %1 = vector.load %arg2[%c0_1, %c0_2] : memref<1x8xf32, #tpu.memory_space<vmem>>, vector<1x8xf32>
    %2 = vector.broadcast %1 : vector<1x8xf32> to vector<64x8xf32>
    %3 = arith.mulf %0, %2 : vector<64x8xf32>
    %c0_3 = arith.constant 0 : index
    %c0_4 = arith.constant 0 : index
    %4 = vector.load %arg3[%c0_3, %c0_4] : memref<1x8xf32, #tpu.memory_space<vmem>>, vector<1x8xf32>
    %5 = vector.broadcast %4 : vector<1x8xf32> to vector<64x8xf32>
    %6 = arith.addf %3, %5 : vector<64x8xf32>
    %cst = arith.constant 0.000000e+00 : f32
    %7 = vector.broadcast %cst : f32 to vector<64x8xf32>
    %8 = arith.maximumf %6, %7 : vector<64x8xf32>
    %c0_5 = arith.constant 0 : index
    %c0_6 = arith.constant 0 : index
    %9 = vector.load %arg4[%c0_5, %c0_6] : memref<64x8xf32, #tpu.memory_space<vmem>>, vector<64x8xf32>
    %c0_7 = arith.constant 0 : index
    %c0_8 = arith.constant 0 : index
    %10 = vector.load %arg5[%c0_7, %c0_8] : memref<1x8xf32, #tpu.memory_space<vmem>>, vector<1x8xf32>
    %11 = vector.broadcast %10 : vector<1x8xf32> to vector<64x8xf32>
    %12 = arith.mulf %9, %11 : vector<64x8xf32>
    %c0_9 = arith.constant 0 : index
    %c0_10 = arith.constant 0 : index
    %13 = vector.load %arg6[%c0_9, %c0_10] : memref<1x8xf32, #tpu.memory_space<vmem>>, vector<1x8xf32>
    %14 = vector.broadcast %13 : vector<1x8xf32> to vector<64x8xf32>
    %15 = arith.addf %12, %14 : vector<64x8xf32>
    %16 = arith.addf %8, %15 : vector<64x8xf32>
    %cst_11 = arith.constant 0.000000e+00 : f32
    %17 = vector.broadcast %cst_11 : f32 to vector<64x8xf32>
    %18 = arith.maximumf %16, %17 : vector<64x8xf32>
    %c0_12 = arith.constant 0 : index
    %c0_13 = arith.constant 0 : index
    %19 = vector.load %arg7[%c0_12, %c0_13] : memref<64x8xf32, #tpu.memory_space<vmem>>, vector<64x8xf32>
    tpu.vector_store %arg7[%c0_12, %c0_13], %18 {strides = array<i32>} : memref<64x8xf32, #tpu.memory_space<vmem>>, vector<64x8xf32>,
    return
  }
  func.func @transform_0(%arg0: i32) -> (i32, i32) {
    %c0_i32 = arith.constant 0 : i32
    %c0_i32_0 = arith.constant 0 : i32
    return %arg0, %c0_i32 : i32, i32
  }
  func.func @transform_1(%arg0: i32) -> (i32, i32) {
    %c0_i32 = arith.constant 0 : i32
    %c0_i32_0 = arith.constant 0 : i32
    %c0_i32_1 = arith.constant 0 : i32
    return %c0_i32, %c0_i32_0 : i32, i32
  }
  func.func @transform_2(%arg0: i32) -> (i32, i32) {
    %c0_i32 = arith.constant 0 : i32
    %c0_i32_0 = arith.constant 0 : i32
    %c0_i32_1 = arith.constant 0 : i32
    return %c0_i32, %c0_i32_0 : i32, i32
  }
  func.func @transform_3(%arg0: i32) -> (i32, i32) {
    %c0_i32 = arith.constant 0 : i32
    %c0_i32_0 = arith.constant 0 : i32
    return %arg0, %c0_i32 : i32, i32
  }
  func.func @transform_4(%arg0: i32) -> (i32, i32) {
    %c0_i32 = arith.constant 0 : i32
    %c0_i32_0 = arith.constant 0 : i32
    %c0_i32_1 = arith.constant 0 : i32
    return %c0_i32, %c0_i32_0 : i32, i32
  }
  func.func @transform_5(%arg0: i32) -> (i32, i32) {
    %c0_i32 = arith.constant 0 : i32
    %c0_i32_0 = arith.constant 0 : i32
    %c0_i32_1 = arith.constant 0 : i32
    return %c0_i32, %c0_i32_0 : i32, i32
  }
  func.func @transform_6(%arg0: i32) -> (i32, i32) {
    %c0_i32 = arith.constant 0 : i32
    %c0_i32_0 = arith.constant 0 : i32
    return %arg0, %c0_i32 : i32, i32
  }
}

</mosaic_0001>

<bundles_post_ra>
// kernel: bottleneck_forward.7
= control target key start
LH: loop header
LB: loop body
LE: loop exit
PB: predicated region body
PF: predicated region fallthrough
CT: control target
= control target key end

     0   :  { %s566_s15 = smov 0   ;;  %s631_s0 = inlined_call_operand.vmem [shape: bf16[128,4], index: 0, kind: input, shape index: {}]   ;;  %s632_s1 = inlined_call_operand.vmem [shape: bf16[4,8], index: 1, kind: input, shape index: {}]   ;;  %s633_s2 = inlined_call_operand.vmem [shape: f32[1,8], index: 2, kind: input, shape index: {}]   ;;  %s634_s3 = inlined_call_operand.vmem [shape: f32[128,8], index: 3, kind: output, shape index: {0}]   ;;  %s635_s4 = inlined_call_operand.vmem [shape: f32[2,2,8], index: 4, kind: output, shape index: {1}]  }
   0x1 LB: > { %s572_s16 = sadd.s32 4294967295, %s539_s15   ;;  %p485_p0 = scmp.ge.s32.totalorder %s539_s15, 1  ;;  %s539_s15 = sphi %s566_s15, %s15_s15  }
   0x2   : > { %p166_p1 = scmp.lt.s32.totalorder %s539_s15, 3 }
   0x4   : > { %p167_p2 = pnand %p485_p0, %p166_p1 }
   0x5   : > { %v221_v0 = vld [vmem:[%s632_s1] sm:$0x3] (!%p167_p2)  ;;  %vm262_vm0 = vcmask (!%p167_p2), 1041408   ;;  %s486_s19 = sshll.u32 (!%p167_p2), %s572_s16, 3  ;;  %vm249_vm1 = vcmask (!%p167_p2), 31744   ;;  %vm331_vm2 = vcmask (!%p167_p2), 64512  }
   0x6   : > { %170 = sbr.rel (%p167_p2) target bundleno = 266 (0x10a), region = 32  ;;  %519 = vmatprep.subr.msk.bf16.mxu0 (!%p167_p2), %vm262_vm0, %v221_v0  ;;  %v264_v1 = vsel (!%p167_p2), %vm262_vm0, %v221_v0, 0  ;;  %p197_p3 = scmp.lt.s32.totalorder (!%p167_p2), %s486_s19, 15  ;;  %520 = vmatprep.subr.msk.bf16.mxu1 (!%p167_p2), %vm262_vm0, %v221_v0  ;;  %v491_v6 = vld [vmem:[%s633_s2] ss:$0 sm:$0xff] (!%p167_p2)  ;;  %vm390_vm3 = vcmask (!%p167_p2), 1040384  }
   0x7   : > { %508 = vmatpush3.bf16.msra.mxu0 (!%p167_p2), %v264_v1  ;;  %518 = vmatpush3.bf16.msra.mxu1 (!%p167_p2), %v264_v1  ;;  %p208_p4 = scmp.lt.s32.totalorder (!%p167_p2), %s572_s16, 1  ;;  %vm392_vm4 = vcmask (!%p167_p2), 58368  }
   0xd   : > { %s637_s19 = smov (!%p197_p3, %s486_s19), 15  ;;  %s639_s16 = smov (!%p208_p4, %s572_s16), 1 }
   0xe   : > { %s487_s20 = sshll.u32 %s637_s19, 2  ;;  %s489_s24 = sshll.u32 %s637_s19, 3 }
   0xf   : > { %s200_s23 = scalar_lea.vmem %s631_s0, %s487_s20  ;;  %s589_s29 = scalar_lea.vmem %s634_s3, %s489_s24 }
  0x10   : > { %v529_v2 = vld [vmem:[%s200_s23] sm:$0xff]   ;;  %v530_v3 = vld [vmem:[%s200_s23 + $0x8] sm:$0xff]   ;;  %v531_v4 = vld [vmem:[%s200_s23 + $0x10] sm:$0xff]   ;;  %s490_s30 = sshll.u32 %s639_s16, 1 }
  0x11   : > { %509 = vmatprep.mubr.msk.bf16.mxu0 %vm249_vm1, %v529_v2  ;;  %v532_v5 = vld [vmem:[%s200_s23 + $0x18] sm:$0xff]   ;;  %513 = vmatprep.mubr.msk.bf16.mxu1 %vm249_vm1, %v531_v4  ;;  %s211_s7 = scalar_lea.vmem %s635_s4, %s490_s30 }
  0x12   : > { %510 = vmatmul.mubr.msk.bf16.vlgmr.msra.gmra.mrb[0].mxu0 %vm249_vm1, %v530_v3  ;;  %514 = vmatmul.mubr.msk.bf16.vlgmr.msra.gmra.mrb[0].mxu1 %vm249_vm1, %v532_v5 }
  0xe5   : > { %v511_v7 = vpop.f32.mrb[0].mxu0  ;;  %v515_v12 = vpop.f32.mrb[0].mxu1 }
  0xe6   : > { %v309_v8 = vadd.f32 %v511_v7, %v491_v6  ;;  %v300_v9 = vpop.f32.mrb[1].mxu0  ;;  %v325_v15 = vadd.f32 %v515_v12, %v491_v6  ;;  %v316_v16 = vpop.f32.mrb[1].mxu1 }
  0xe7   : > { %v301_v10 = vadd.f32 %v491_v6, %v300_v9  ;;  %v512_v11 = vpop.f32.mrb[2].mxu0  ;;  %v317_v19 = vadd.f32 %v491_v6, %v316_v16  ;;  %v516_v20 = vpop.f32.mrb[2].mxu1 }
  0xe8   : > { %334 = vst.msk [vmem:[%s589_s29 + $0x10] sm:$0xff] %vm331_vm2, %v309_v8  ;;  %v312_v13 = vadd.f32 %v512_v11, %v491_v6  ;;  %v303_v14 = vpop.f32.mrb[3].mxu0  ;;  %338 = vst.msk [vmem:[%s589_s29 + $0x30] sm:$0xff] %vm331_vm2, %v325_v15  ;;  %v319_v21 = vpop.f32.mrb[3].mxu1  ;;  %v363_v22 = vmul.f32 %v309_v8, %v309_v8  ;;  %v343_v26 = vsel %vm331_vm2, %v309_v8, 0.0  ;;  %v328_v32 = vadd.f32 %v516_v20, %v491_v6 }
  0xe9   : > { %332 = vst.msk [vmem:[%s589_s29] sm:$0xff] %vm331_vm2, %v301_v10  ;;  %v361_v17 = vmul.f32 %v301_v10, %v301_v10  ;;  %v304_v18 = vadd.f32 %v491_v6, %v303_v14  ;;  %v340_v23 = vsel %vm331_vm2, %v301_v10, 0.0  ;;  %336 = vst.msk [vmem:[%s589_s29 + $0x20] sm:$0xff] %vm331_vm2, %v317_v19  ;;  %v365_v31 = vmul.f32 %v317_v19, %v317_v19 }
  0xea   : > { %335 = vst.msk [vmem:[%s589_s29 + $0x18] sm:$0xff] %vm331_vm2, %v312_v13  ;;  %v364_v28 = vmul.f32 %v312_v13, %v312_v13  ;;  %v320_v33 = vadd.f32 %v491_v6, %v319_v21  ;;  %v372_v36 = vsel %vm331_vm2, %v363_v22, 0.0  ;;  %v345_v37 = vsel %vm331_vm2, %v312_v13, 0.0  ;;  %339 = vst.msk [vmem:[%s589_s29 + $0x38] sm:$0xff] %vm331_vm2, %v328_v32 }
  0xeb   : > { %333 = vst.msk [vmem:[%s589_s29 + $0x8] sm:$0xff] %vm331_vm2, %v304_v18  ;;  %v341_v24 = vsel %vm331_vm2, %v304_v18, 0.0  ;;  %v362_v25 = vmul.f32 %v304_v18, %v304_v18  ;;  %v369_v27 = vsel %vm331_vm2, %v361_v17, 0.0  ;;  %v347_v38 = vsel %vm331_vm2, %v317_v19, 0.0 }
  0xec   : > { %v342_v29 = vadd.f32 %v341_v24, %v340_v23  ;;  %337 = vst.msk [vmem:[%s589_s29 + $0x28] sm:$0xff] %vm331_vm2, %v320_v33  ;;  %v374_v41 = vsel %vm331_vm2, %v364_v28, 0.0  ;;  %v376_v42 = vsel %vm331_vm2, %v365_v31, 0.0  ;;  %v366_v43 = vmul.f32 %v320_v33, %v320_v33 }
  0xed   : > { %v370_v30 = vsel %vm331_vm2, %v362_v25, 0.0  ;;  %v367_v46 = vmul.f32 %v325_v15, %v325_v15  ;;  %v349_v47 = vsel %vm331_vm2, %v320_v33, 0.0  ;;  %v351_v50 = vsel %vm331_vm2, %v325_v15, 0.0 }
  0xee   : > { %v344_v34 = vadd.f32 %v343_v26, %v342_v29  ;;  %v371_v35 = vadd.f32 %v370_v30, %v369_v27  ;;  %v368_v51 = vmul.f32 %v328_v32, %v328_v32  ;;  %v378_v52 = vsel %vm331_vm2, %v366_v43, 0.0 }
  0xef   : > { %v380_v55 = vsel %vm331_vm2, %v367_v46, 0.0  ;;  %v353_v56 = vsel %vm331_vm2, %v328_v32, 0.0 }
  0xf0   : > { %v373_v39 = vadd.f32 %v372_v36, %v371_v35  ;;  %v346_v40 = vadd.f32 %v345_v37, %v344_v34  ;;  %v382_v59 = vsel %vm331_vm2, %v368_v51, 0.0 }
  0xf2   : > { %v348_v44 = vadd.f32 %v347_v38, %v346_v40  ;;  %v375_v45 = vadd.f32 %v374_v41, %v373_v39 }
  0xf4   : > { %v377_v48 = vadd.f32 %v376_v42, %v375_v45  ;;  %v350_v49 = vadd.f32 %v349_v47, %v348_v44 }
  0xf6   : > { %v352_v53 = vadd.f32 %v351_v50, %v350_v49  ;;  %v379_v54 = vadd.f32 %v378_v52, %v377_v48 }
  0xf8   : > { %v354_v57 = vadd.f32 %v353_v56, %v352_v53  ;;  %v381_v58 = vadd.f32 %v380_v55, %v379_v54 }
  0xfa   : > { %v355_v60 = vrot.slane %v354_v57, 4  ;;  %v383_v61 = vadd.f32 %v382_v59, %v381_v58 }
  0xfc   : > { %v356_v62 = vadd.f32 %v355_v60, %v354_v57  ;;  %v384_v63 = vrot.slane %v383_v61, 4 }
  0xfe   : > { %v357_v0 = vrot.slane %v356_v62, 2  ;;  %v385_v1 = vadd.f32 %v384_v63, %v383_v61 }
 0x100   : > { %v358_v2 = vadd.f32 %v357_v0, %v356_v62  ;;  %v386_v3 = vrot.slane %v385_v1, 2 }
 0x102   : > { %v359_v4 = vrot.slane %v358_v2, 1  ;;  %v387_v5 = vadd.f32 %v386_v3, %v385_v1 }
 0x104   : > { %v388_v6 = vrot.slane %v387_v5, 1  ;;  %v360_v7 = vadd.f32 %v359_v4, %v358_v2 }
 0x106   : > { %v389_v8 = vadd.f32 %v388_v6, %v387_v5 }
 0x108   : > { %v391_v9 = vsel %vm390_vm3, %v360_v7, %v389_v8 }
 0x109   : > { %393 = vst.msk [vmem:[%s211_s7] sm:$0x3] %vm392_vm4, %v391_v9 }
 0x10a PF: > { %s15_s15 = sadd.s32 1, %s539_s15  }
 0x10b   : > { %p12_p5 = scmp.ge.s32.totalorder %s15_s15, 4  }
 0x10d   :  { %14 = sbr.rel (!%p12_p5) target bundleno = 1 (0x1), region = 74 }

// kernel: bottleneck_forward.6
= control target key start
LH: loop header
LB: loop body
LE: loop exit
PB: predicated region body
PF: predicated region fallthrough
CT: control target
= control target key end

     0   :  { %s334_s12 = smov 0   ;;  %s365_s0 = inlined_call_operand.vmem [shape: f32[128,8], index: 0, kind: input, shape index: {}]   ;;  %s366_s1 = inlined_call_operand.vmem [shape: f32[1,8], index: 1, kind: input, shape index: {}]   ;;  %s367_s2 = inlined_call_operand.vmem [shape: f32[1,8], index: 2, kind: input, shape index: {}]   ;;  %s368_s3 = inlined_call_operand.vmem [shape: f32[128,8], index: 3, kind: output, shape index: {}]  }
   0x1 LB: > { %s285_s13 = sadd.s32 4294967295, %s312_s12   ;;  %p289_p0 = scmp.ge.s32.totalorder %s312_s12, 1  ;;  %s312_s12 = sphi %s334_s12, %s13_s12  }
   0x2   : > { %p138_p1 = scmp.lt.s32.totalorder %s312_s12, 3 }
   0x4   : > { %p139_p2 = pnand %p289_p0, %p138_p1 }
   0x5   : > { %s290_s14 = sshll.u32 (!%p139_p2), %s285_s13, 3  ;;  %v294_v0 = vld [vmem:[%s366_s1] ss:$0 sm:$0xff] (!%p139_p2)  ;;  %vm220_vm0 = vcmask (!%p139_p2), 64512  }
   0x6   : > { %142 = sbr.rel (%p139_p2) target bundleno = 27 (0x1b), region = 32  ;;  %p163_p3 = scmp.lt.s32.totalorder (!%p139_p2), %s290_s14, 15  ;;  %v295_v1 = vld [vmem:[%s367_s2] ss:$0 sm:$0xff] (!%p139_p2) }
   0xd   : > { %s370_s14 = smov (!%p163_p3, %s290_s14), 15 }
   0xe   : > { %s291_s15 = sshll.u32 %s370_s14, 3 }
   0xf   : > { %s166_s20 = scalar_lea.vmem %s365_s0, %s291_s15  ;;  %s172_s25 = scalar_lea.vmem %s368_s3, %s291_s15 }
  0x10   : > { %v174_v2 = vld [vmem:[%s166_s20] sm:$0xff]  ;;  %v175_v3 = vld [vmem:[%s166_s20 + $0x8] sm:$0xff]  ;;  %v176_v4 = vld [vmem:[%s166_s20 + $0x10] sm:$0xff] }
  0x11   : > { %v189_v5 = vmul.f32 %v294_v0, %v174_v2  ;;  %v190_v6 = vmul.f32 %v294_v0, %v175_v3  ;;  %v191_v7 = vmul.f32 %v294_v0, %v176_v4  ;;  %v177_v8 = vld [vmem:[%s166_s20 + $0x18] sm:$0xff]  ;;  %v178_v9 = vld [vmem:[%s166_s20 + $0x20] sm:$0xff]  ;;  %v179_v10 = vld [vmem:[%s166_s20 + $0x28] sm:$0xff] }
  0x12   : > { %v192_v11 = vmul.f32 %v294_v0, %v177_v8  ;;  %v193_v12 = vmul.f32 %v294_v0, %v178_v9  ;;  %v194_v13 = vmul.f32 %v294_v0, %v179_v10  ;;  %v180_v14 = vld [vmem:[%s166_s20 + $0x30] sm:$0xff]  ;;  %v181_v15 = vld [vmem:[%s166_s20 + $0x38] sm:$0xff] }
  0x13   : > { %v204_v16 = vadd.f32 %v295_v1, %v189_v5  ;;  %v205_v17 = vadd.f32 %v295_v1, %v190_v6  ;;  %v206_v18 = vadd.f32 %v295_v1, %v191_v7  ;;  %v195_v19 = vmul.f32 %v294_v0, %v180_v14 }
  0x14   : > { %v207_v20 = vadd.f32 %v295_v1, %v192_v11  ;;  %v208_v21 = vadd.f32 %v295_v1, %v193_v12  ;;  %v209_v22 = vadd.f32 %v295_v1, %v194_v13  ;;  %v196_v23 = vmul.f32 %v294_v0, %v181_v15 }
  0x15   : > { %v212_v24 = vmax.f32 %v204_v16, 0.0  ;;  %v213_v25 = vmax.f32 %v205_v17, 0.0  ;;  %v214_v26 = vmax.f32 %v206_v18, 0.0  ;;  %v210_v27 = vadd.f32 %v295_v1, %v195_v19 }
  0x16   : > { %v215_v28 = vmax.f32 %v207_v20, 0.0  ;;  %v216_v29 = vmax.f32 %v208_v21, 0.0  ;;  %v217_v30 = vmax.f32 %v209_v22, 0.0  ;;  %v211_v31 = vadd.f32 %v295_v1, %v196_v23 }
  0x17   : > { %221 = vst.msk [vmem:[%s172_s25] sm:$0xff] %vm220_vm0, %v212_v24  ;;  %222 = vst.msk [vmem:[%s172_s25 + $0x8] sm:$0xff] %vm220_vm0, %v213_v25  ;;  %v218_v32 = vmax.f32 %v210_v27, 0.0 }
  0x18   : > { %223 = vst.msk [vmem:[%s172_s25 + $0x10] sm:$0xff] %vm220_vm0, %v214_v26  ;;  %224 = vst.msk [vmem:[%s172_s25 + $0x18] sm:$0xff] %vm220_vm0, %v215_v28  ;;  %v219_v33 = vmax.f32 %v211_v31, 0.0 }
  0x19   : > { %225 = vst.msk [vmem:[%s172_s25 + $0x20] sm:$0xff] %vm220_vm0, %v216_v29  ;;  %226 = vst.msk [vmem:[%s172_s25 + $0x28] sm:$0xff] %vm220_vm0, %v217_v30 }
  0x1a   : > { %227 = vst.msk [vmem:[%s172_s25 + $0x30] sm:$0xff] %vm220_vm0, %v218_v32  ;;  %228 = vst.msk [vmem:[%s172_s25 + $0x38] sm:$0xff] %vm220_vm0, %v219_v33 }
  0x1b PF: > { %s13_s12 = sadd.s32 1, %s312_s12  }
  0x1c   : > { %p10_p4 = scmp.ge.s32.totalorder %s13_s12, 4  }
  0x1e   :  { %12 = sbr.rel (!%p10_p4) target bundleno = 1 (0x1), region = 62 }

// kernel: bottleneck_forward.5
= control target key start
LH: loop header
LB: loop body
LE: loop exit
PB: predicated region body
PF: predicated region fallthrough
CT: control target
= control target key end

     0   :  { %s601_s15 = smov 0   ;;  %s672_s0 = inlined_call_operand.vmem [shape: bf16[128,36], index: 0, kind: input, shape index: {}]   ;;  %s673_s1 = inlined_call_operand.vmem [shape: bf16[36,8], index: 1, kind: input, shape index: {}]   ;;  %s674_s2 = inlined_call_operand.vmem [shape: f32[1,8], index: 2, kind: input, shape index: {}]   ;;  %s675_s3 = inlined_call_operand.vmem [shape: f32[128,8], index: 3, kind: output, shape index: {0}]   ;;  %s676_s4 = inlined_call_operand.vmem [shape: f32[2,2,8], index: 4, kind: output, shape index: {1}]  }
   0x1 LB: > { %s607_s16 = sadd.s32 4294967295, %s574_s15   ;;  %p504_p0 = scmp.ge.s32.totalorder %s574_s15, 1  ;;  %s574_s15 = sphi %s601_s15, %s15_s15  }
   0x2   : > { %p166_p1 = scmp.lt.s32.totalorder %s574_s15, 3 }
   0x4   : > { %p167_p2 = pnand %p504_p0, %p166_p1 }
   0x5   : > { %v561_v0 = vld [vmem:[%s673_s1] sm:$0xff] (!%p167_p2)   ;;  %v562_v1 = vld [vmem:[%s673_s1 + $0x8] sm:$0xff] (!%p167_p2)   ;;  %s505_s21 = sshll.u32 (!%p167_p2), %s607_s16, 3  ;;  %v563_v2 = vld [vmem:[%s673_s1 + $0x10] ss:$0 sps:$4 sm:$0x33] (!%p167_p2)  }
   0x6   : > { %170 = sbr.rel (%p167_p2) target bundleno = 266 (0x10a), region = 32  ;;  %531 = vmatprep.subr.bf16.mxu0 (!%p167_p2), %v561_v0  ;;  %545 = vmatprep.subr.bf16.mxu1 (!%p167_p2), %v561_v0  ;;  %p197_p3 = scmp.lt.s32.totalorder (!%p167_p2), %s505_s21, 15  ;;  %vm281_vm0 = vcmask (!%p167_p2), 1041408   ;;  %vm268_vm1 = vcmask (!%p167_p2), 293888   ;;  %v510_v8 = vld [vmem:[%s674_s2] ss:$0 sm:$0xff] (!%p167_p2) }
   0x7   : > { %532 = vmatpush3.bf16.msra.mxu0 (!%p167_p2), %v561_v0  ;;  %548 = vmatpush3.bf16.msra.mxu1 (!%p167_p2), %v561_v0  ;;  %v283_v3 = vsel (!%p167_p2), %vm281_vm0, %v563_v2, 0  ;;  %vm350_vm2 = vcmask (!%p167_p2), 64512   ;;  %p208_p4 = scmp.lt.s32.totalorder (!%p167_p2), %s607_s16, 1  ;;  %vm409_vm3 = vcmask (!%p167_p2), 1040384   ;;  %vm411_vm4 = vcmask (!%p167_p2), 58368  }
   0x8   : > { %533 = vmatprep.subr.bf16.mxu0 (!%p167_p2), %v562_v1  ;;  %546 = vmatprep.subr.bf16.mxu1 (!%p167_p2), %v562_v1 }
   0xb   : > { %534 = vmatpush3.bf16.msra.mxu0 (!%p167_p2), %v562_v1  ;;  %549 = vmatpush3.bf16.msra.mxu1 (!%p167_p2), %v562_v1 }
   0xc   : > { %551 = vmatprep.subr.msk.bf16.mxu0 (!%p167_p2), %vm281_vm0, %v563_v2  ;;  %552 = vmatprep.subr.msk.bf16.mxu1 (!%p167_p2), %vm281_vm0, %v563_v2 }
   0xd   : > { %s678_s21 = smov (!%p197_p3, %s505_s21), 15  ;;  %s680_s16 = smov (!%p208_p4, %s607_s16), 1 }
   0xe   : > { %s506_s24 = sshll.u32 %s678_s21, 2  ;;  %s508_s28 = sshll.u32 %s678_s21, 3 }
   0xf   : > { %s200_s27 = scalar_lea.vmem %s672_s0, %s506_s24  ;;  %536 = vmatpush3.bf16.msra.mxu0 %v283_v3  ;;  %550 = vmatpush3.bf16.msra.mxu1 %v283_v3  ;;  %s630_s7 = scalar_lea.vmem %s675_s3, %s508_s28 }
  0x10   : > { %v564_v4 = vld [vmem:[%s200_s27] sm:$0xff]   ;;  %v565_v5 = vld [vmem:[%s200_s27 + $0x8] sm:$0xff]   ;;  %v566_v6 = vld [vmem:[%s200_s27 + $0x10] sm:$0xff]   ;;  %s509_s8 = sshll.u32 %s680_s16, 1 }
  0x11   : > { %537 = vmatprep.mubr.msk.bf16.mxu0 %vm268_vm1, %v564_v4  ;;  %v567_v7 = vld [vmem:[%s200_s27 + $0x18] sm:$0xff]   ;;  %541 = vmatprep.mubr.msk.bf16.mxu1 %vm268_vm1, %v566_v6  ;;  %s211_s11 = scalar_lea.vmem %s676_s4, %s509_s8 }
  0x12   : > { %538 = vmatmul.mubr.msk.bf16.vlgmr.msra.gmra.mrb[0].mxu0 %vm268_vm1, %v565_v5  ;;  %542 = vmatmul.mubr.msk.bf16.vlgmr.msra.gmra.mrb[0].mxu1 %vm268_vm1, %v567_v7 }
  0xe5   : > { %v539_v9 = vpop.f32.mrb[0].mxu0  ;;  %v543_v10 = vpop.f32.mrb[0].mxu1 }
  0xe6   : > { %v328_v11 = vadd.f32 %v539_v9, %v510_v8  ;;  %v319_v12 = vpop.f32.mrb[1].mxu0  ;;  %v344_v13 = vadd.f32 %v543_v10, %v510_v8  ;;  %v335_v14 = vpop.f32.mrb[1].mxu1 }
  0xe7   : > { %v320_v15 = vadd.f32 %v510_v8, %v319_v12  ;;  %v540_v16 = vpop.f32.mrb[2].mxu0  ;;  %v336_v17 = vadd.f32 %v510_v8, %v335_v14  ;;  %v544_v18 = vpop.f32.mrb[2].mxu1 }
  0xe8   : > { %353 = vst.msk [vmem:[%s630_s7 + $0x10] sm:$0xff] %vm350_vm2, %v328_v11  ;;  %v331_v19 = vadd.f32 %v540_v16, %v510_v8  ;;  %v322_v20 = vpop.f32.mrb[3].mxu0  ;;  %357 = vst.msk [vmem:[%s630_s7 + $0x30] sm:$0xff] %vm350_vm2, %v344_v13  ;;  %v338_v21 = vpop.f32.mrb[3].mxu1  ;;  %v382_v24 = vmul.f32 %v328_v11, %v328_v11  ;;  %v362_v28 = vsel %vm350_vm2, %v328_v11, 0.0  ;;  %v347_v31 = vadd.f32 %v544_v18, %v510_v8 }
  0xe9   : > { %351 = vst.msk [vmem:[%s630_s7] sm:$0xff] %vm350_vm2, %v320_v15  ;;  %v380_v22 = vmul.f32 %v320_v15, %v320_v15  ;;  %v323_v23 = vadd.f32 %v510_v8, %v322_v20  ;;  %355 = vst.msk [vmem:[%s630_s7 + $0x20] sm:$0xff] %vm350_vm2, %v336_v17  ;;  %v359_v25 = vsel %vm350_vm2, %v320_v15, 0.0  ;;  %v384_v34 = vmul.f32 %v336_v17, %v336_v17 }
  0xea   : > { %354 = vst.msk [vmem:[%s630_s7 + $0x18] sm:$0xff] %vm350_vm2, %v331_v19  ;;  %v383_v29 = vmul.f32 %v331_v19, %v331_v19  ;;  %v339_v35 = vadd.f32 %v510_v8, %v338_v21  ;;  %358 = vst.msk [vmem:[%s630_s7 + $0x38] sm:$0xff] %vm350_vm2, %v347_v31  ;;  %v391_v38 = vsel %vm350_vm2, %v382_v24, 0.0  ;;  %v364_v39 = vsel %vm350_vm2, %v331_v19, 0.0 }
  0xeb   : > { %352 = vst.msk [vmem:[%s630_s7 + $0x8] sm:$0xff] %vm350_vm2, %v323_v23  ;;  %v360_v26 = vsel %vm350_vm2, %v323_v23, 0.0  ;;  %v381_v27 = vmul.f32 %v323_v23, %v323_v23  ;;  %v388_v32 = vsel %vm350_vm2, %v380_v22, 0.0  ;;  %v366_v40 = vsel %vm350_vm2, %v336_v17, 0.0 }
  0xec   : > { %v361_v30 = vadd.f32 %v360_v26, %v359_v25  ;;  %356 = vst.msk [vmem:[%s630_s7 + $0x28] sm:$0xff] %vm350_vm2, %v339_v35  ;;  %v393_v43 = vsel %vm350_vm2, %v383_v29, 0.0  ;;  %v395_v44 = vsel %vm350_vm2, %v384_v34, 0.0  ;;  %v385_v45 = vmul.f32 %v339_v35, %v339_v35 }
  0xed   : > { %v389_v33 = vsel %vm350_vm2, %v381_v27, 0.0  ;;  %v386_v48 = vmul.f32 %v344_v13, %v344_v13  ;;  %v368_v49 = vsel %vm350_vm2, %v339_v35, 0.0  ;;  %v370_v52 = vsel %vm350_vm2, %v344_v13, 0.0 }
  0xee   : > { %v363_v36 = vadd.f32 %v362_v28, %v361_v30  ;;  %v390_v37 = vadd.f32 %v389_v33, %v388_v32  ;;  %v387_v53 = vmul.f32 %v347_v31, %v347_v31  ;;  %v397_v54 = vsel %vm350_vm2, %v385_v45, 0.0 }
  0xef   : > { %v399_v57 = vsel %vm350_vm2, %v386_v48, 0.0  ;;  %v372_v58 = vsel %vm350_vm2, %v347_v31, 0.0 }
  0xf0   : > { %v392_v41 = vadd.f32 %v391_v38, %v390_v37  ;;  %v365_v42 = vadd.f32 %v364_v39, %v363_v36  ;;  %v401_v61 = vsel %vm350_vm2, %v387_v53, 0.0 }
  0xf2   : > { %v367_v46 = vadd.f32 %v366_v40, %v365_v42  ;;  %v394_v47 = vadd.f32 %v393_v43, %v392_v41 }
  0xf4   : > { %v396_v50 = vadd.f32 %v395_v44, %v394_v47  ;;  %v369_v51 = vadd.f32 %v368_v49, %v367_v46 }
  0xf6   : > { %v371_v55 = vadd.f32 %v370_v52, %v369_v51  ;;  %v398_v56 = vadd.f32 %v397_v54, %v396_v50 }
  0xf8   : > { %v373_v59 = vadd.f32 %v372_v58, %v371_v55  ;;  %v400_v60 = vadd.f32 %v399_v57, %v398_v56 }
  0xfa   : > { %v374_v62 = vrot.slane %v373_v59, 4  ;;  %v402_v63 = vadd.f32 %v401_v61, %v400_v60 }
  0xfc   : > { %v375_v0 = vadd.f32 %v374_v62, %v373_v59  ;;  %v403_v1 = vrot.slane %v402_v63, 4 }
  0xfe   : > { %v376_v2 = vrot.slane %v375_v0, 2  ;;  %v404_v3 = vadd.f32 %v403_v1, %v402_v63 }
 0x100   : > { %v377_v4 = vadd.f32 %v376_v2, %v375_v0  ;;  %v405_v5 = vrot.slane %v404_v3, 2 }
 0x102   : > { %v378_v6 = vrot.slane %v377_v4, 1  ;;  %v406_v7 = vadd.f32 %v405_v5, %v404_v3 }
 0x104   : > { %v407_v8 = vrot.slane %v406_v7, 1  ;;  %v379_v9 = vadd.f32 %v378_v6, %v377_v4 }
 0x106   : > { %v408_v10 = vadd.f32 %v407_v8, %v406_v7 }
 0x108   : > { %v410_v11 = vsel %vm409_vm3, %v379_v9, %v408_v10 }
 0x109   : > { %412 = vst.msk [vmem:[%s211_s11] sm:$0x3] %vm411_vm4, %v410_v11 }
 0x10a PF: > { %s15_s15 = sadd.s32 1, %s574_s15  }
 0x10b   : > { %p12_p5 = scmp.ge.s32.totalorder %s15_s15, 4  }
 0x10d   :  { %14 = sbr.rel (!%p12_p5) target bundleno = 1 (0x1), region = 74 }

// kernel: bottleneck_forward.8
= control target key start
LH: loop header
LB: loop body
LE: loop exit
PB: predicated region body
PF: predicated region fallthrough
CT: control target
= control target key end

     0   :  { %s631_s15 = smov 0   ;;  %s716_s0 = inlined_call_operand.vmem [shape: bf16[128,72], index: 0, kind: input, shape index: {}]   ;;  %s717_s1 = inlined_call_operand.vmem [shape: bf16[72,8], index: 1, kind: input, shape index: {}]   ;;  %s718_s2 = inlined_call_operand.vmem [shape: f32[1,8], index: 2, kind: input, shape index: {}]   ;;  %s719_s3 = inlined_call_operand.vmem [shape: f32[128,8], index: 3, kind: output, shape index: {0}]   ;;  %s720_s4 = inlined_call_operand.vmem [shape: f32[2,2,8], index: 4, kind: output, shape index: {1}]  }
   0x1 LB: > { %s637_s16 = sadd.s32 4294967295, %s604_s15   ;;  %p520_p0 = scmp.ge.s32.totalorder %s604_s15, 1  ;;  %s604_s15 = sphi %s631_s15, %s15_s15  }
   0x2   : > { %p166_p1 = scmp.lt.s32.totalorder %s604_s15, 3 }
   0x4   : > { %p167_p2 = pnand %p520_p0, %p166_p1 }
   0x5   : > { %v589_v0 = vld [vmem:[%s717_s1] sm:$0xff] (!%p167_p2)   ;;  %v590_v1 = vld [vmem:[%s717_s1 + $0x8] sm:$0xff] (!%p167_p2)   ;;  %s521_s21 = sshll.u32 (!%p167_p2), %s637_s16, 3  ;;  %v591_v2 = vld [vmem:[%s717_s1 + $0x10] sm:$0xff] (!%p167_p2)   ;;  %vm284_vm0 = vcmask (!%p167_p2), 588800   ;;  %vm297_vm1 = vcmask (!%p167_p2), 1043456  }
   0x6   : > { %170 = sbr.rel (%p167_p2) target bundleno = 274 (0x112), region = 32  ;;  %551 = vmatprep.subr.bf16.mxu0 (!%p167_p2), %v589_v0  ;;  %569 = vmatprep.subr.bf16.mxu1 (!%p167_p2), %v589_v0  ;;  %p197_p3 = scmp.lt.s32.totalorder (!%p167_p2), %s521_s21, 15  ;;  %v592_v3 = vld [vmem:[%s717_s1 + $0x18] sm:$0xff] (!%p167_p2)   ;;  %v593_v6 = vld [vmem:[%s717_s1 + $0x20] ss:$0 sps:$4 sm:$0xff] (!%p167_p2)   ;;  %vm366_vm2 = vcmask (!%p167_p2), 64512  }
   0x7   : > { %552 = vmatpush3.bf16.msra.mxu0 (!%p167_p2), %v589_v0  ;;  %574 = vmatpush3.bf16.msra.mxu1 (!%p167_p2), %v589_v0  ;;  %v299_v7 = vsel (!%p167_p2), %vm297_vm1, %v593_v6, 0  ;;  %v526_v10 = vld [vmem:[%s718_s2] ss:$0 sm:$0xff] (!%p167_p2)  ;;  %p208_p4 = scmp.lt.s32.totalorder (!%p167_p2), %s637_s16, 1  ;;  %vm425_vm3 = vcmask (!%p167_p2), 1040384   ;;  %vm427_vm4 = vcmask (!%p167_p2), 58368  }
   0x8   : > { %553 = vmatprep.subr.bf16.mxu0 (!%p167_p2), %v590_v1  ;;  %570 = vmatprep.subr.bf16.mxu1 (!%p167_p2), %v590_v1 }
   0xb   : > { %554 = vmatpush3.bf16.msra.mxu0 (!%p167_p2), %v590_v1  ;;  %575 = vmatpush3.bf16.msra.mxu1 (!%p167_p2), %v590_v1 }
   0xc   : > { %555 = vmatprep.subr.bf16.mxu0 (!%p167_p2), %v591_v2  ;;  %571 = vmatprep.subr.bf16.mxu1 (!%p167_p2), %v591_v2 }
   0xd   : > { %s722_s21 = smov (!%p197_p3, %s521_s21), 15  ;;  %s724_s16 = smov (!%p208_p4, %s637_s16), 1 }
   0xe   : > { %s522_s24 = sshll.u32 %s722_s21, 2  ;;  %s524_s6 = sshll.u32 %s722_s21, 3 }
   0xf   : > { %s200_s29 = scalar_lea.vmem %s716_s0, %s522_s24  ;;  %556 = vmatpush3.bf16.msra.mxu0 %v591_v2  ;;  %576 = vmatpush3.bf16.msra.mxu1 %v591_v2  ;;  %s674_s11 = scalar_lea.vmem %s719_s3, %s524_s6 }
  0x10   : > { %v594_v4 = vld [vmem:[%s200_s29] sm:$0xff]   ;;  %v596_v5 = vld [vmem:[%s200_s29 + $0x10] sm:$0xff]   ;;  %557 = vmatprep.subr.bf16.mxu0 %v592_v3  ;;  %572 = vmatprep.subr.bf16.mxu1 %v592_v3  ;;  %v595_v8 = vld [vmem:[%s200_s29 + $0x8] sm:$0xff]   ;;  %s525_s12 = sshll.u32 %s724_s16, 1 }
  0x11   : > { %561 = vmatprep.mubr.msk.bf16.mxu0 %vm284_vm0, %v594_v4  ;;  %565 = vmatprep.mubr.msk.bf16.mxu1 %vm284_vm0, %v596_v5  ;;  %v597_v9 = vld [vmem:[%s200_s29 + $0x18] sm:$0xff]   ;;  %s211_s17 = scalar_lea.vmem %s720_s4, %s525_s12 }
  0x13   : > { %558 = vmatpush3.bf16.msra.mxu0 %v592_v3  ;;  %577 = vmatpush3.bf16.msra.mxu1 %v592_v3 }
  0x14   : > { %579 = vmatprep.subr.msk.bf16.mxu0 %vm297_vm1, %v593_v6  ;;  %580 = vmatprep.subr.msk.bf16.mxu1 %vm297_vm1, %v593_v6 }
  0x17   : > { %560 = vmatpush3.bf16.msra.mxu0 %v299_v7  ;;  %578 = vmatpush3.bf16.msra.mxu1 %v299_v7 }
  0x1a   : > { %562 = vmatmul.mubr.msk.bf16.vlgmr.msra.gmra.mrb[0].mxu0 %vm284_vm0, %v595_v8  ;;  %566 = vmatmul.mubr.msk.bf16.vlgmr.msra.gmra.mrb[0].mxu1 %vm284_vm0, %v597_v9 }
  0xed   : > { %v563_v11 = vpop.f32.mrb[0].mxu0  ;;  %v567_v12 = vpop.f32.mrb[0].mxu1 }
  0xee   : > { %v344_v13 = vadd.f32 %v563_v11, %v526_v10  ;;  %v335_v14 = vpop.f32.mrb[1].mxu0  ;;  %v360_v15 = vadd.f32 %v567_v12, %v526_v10  ;;  %v351_v16 = vpop.f32.mrb[1].mxu1 }
  0xef   : > { %v336_v17 = vadd.f32 %v526_v10, %v335_v14  ;;  %v564_v18 = vpop.f32.mrb[2].mxu0  ;;  %v352_v19 = vadd.f32 %v526_v10, %v351_v16  ;;  %v568_v20 = vpop.f32.mrb[2].mxu1 }
  0xf0   : > { %369 = vst.msk [vmem:[%s674_s11 + $0x10] sm:$0xff] %vm366_vm2, %v344_v13  ;;  %v347_v21 = vadd.f32 %v564_v18, %v526_v10  ;;  %v338_v22 = vpop.f32.mrb[3].mxu0  ;;  %373 = vst.msk [vmem:[%s674_s11 + $0x30] sm:$0xff] %vm366_vm2, %v360_v15  ;;  %v354_v23 = vpop.f32.mrb[3].mxu1  ;;  %v398_v26 = vmul.f32 %v344_v13, %v344_v13  ;;  %v378_v30 = vsel %vm366_vm2, %v344_v13, 0.0  ;;  %v363_v33 = vadd.f32 %v568_v20, %v526_v10 }
  0xf1   : > { %367 = vst.msk [vmem:[%s674_s11] sm:$0xff] %vm366_vm2, %v336_v17  ;;  %v396_v24 = vmul.f32 %v336_v17, %v336_v17  ;;  %v339_v25 = vadd.f32 %v526_v10, %v338_v22  ;;  %371 = vst.msk [vmem:[%s674_s11 + $0x20] sm:$0xff] %vm366_vm2, %v352_v19  ;;  %v375_v27 = vsel %vm366_vm2, %v336_v17, 0.0  ;;  %v400_v36 = vmul.f32 %v352_v19, %v352_v19 }
  0xf2   : > { %370 = vst.msk [vmem:[%s674_s11 + $0x18] sm:$0xff] %vm366_vm2, %v347_v21  ;;  %v399_v31 = vmul.f32 %v347_v21, %v347_v21  ;;  %v355_v37 = vadd.f32 %v526_v10, %v354_v23  ;;  %374 = vst.msk [vmem:[%s674_s11 + $0x38] sm:$0xff] %vm366_vm2, %v363_v33  ;;  %v407_v40 = vsel %vm366_vm2, %v398_v26, 0.0  ;;  %v380_v41 = vsel %vm366_vm2, %v347_v21, 0.0 }
  0xf3   : > { %368 = vst.msk [vmem:[%s674_s11 + $0x8] sm:$0xff] %vm366_vm2, %v339_v25  ;;  %v376_v28 = vsel %vm366_vm2, %v339_v25, 0.0  ;;  %v397_v29 = vmul.f32 %v339_v25, %v339_v25  ;;  %v404_v34 = vsel %vm366_vm2, %v396_v24, 0.0  ;;  %v382_v42 = vsel %vm366_vm2, %v352_v19, 0.0 }
  0xf4   : > { %v377_v32 = vadd.f32 %v376_v28, %v375_v27  ;;  %372 = vst.msk [vmem:[%s674_s11 + $0x28] sm:$0xff] %vm366_vm2, %v355_v37  ;;  %v409_v45 = vsel %vm366_vm2, %v399_v31, 0.0  ;;  %v411_v46 = vsel %vm366_vm2, %v400_v36, 0.0  ;;  %v401_v47 = vmul.f32 %v355_v37, %v355_v37 }
  0xf5   : > { %v405_v35 = vsel %vm366_vm2, %v397_v29, 0.0  ;;  %v402_v50 = vmul.f32 %v360_v15, %v360_v15  ;;  %v384_v51 = vsel %vm366_vm2, %v355_v37, 0.0  ;;  %v386_v54 = vsel %vm366_vm2, %v360_v15, 0.0 }
  0xf6   : > { %v379_v38 = vadd.f32 %v378_v30, %v377_v32  ;;  %v406_v39 = vadd.f32 %v405_v35, %v404_v34  ;;  %v403_v55 = vmul.f32 %v363_v33, %v363_v33  ;;  %v413_v56 = vsel %vm366_vm2, %v401_v47, 0.0 }
  0xf7   : > { %v415_v59 = vsel %vm366_vm2, %v402_v50, 0.0  ;;  %v388_v60 = vsel %vm366_vm2, %v363_v33, 0.0 }
  0xf8   : > { %v408_v43 = vadd.f32 %v407_v40, %v406_v39  ;;  %v381_v44 = vadd.f32 %v380_v41, %v379_v38  ;;  %v417_v63 = vsel %vm366_vm2, %v403_v55, 0.0 }
  0xfa   : > { %v383_v48 = vadd.f32 %v382_v42, %v381_v44  ;;  %v410_v49 = vadd.f32 %v409_v45, %v408_v43 }
  0xfc   : > { %v412_v52 = vadd.f32 %v411_v46, %v410_v49  ;;  %v385_v53 = vadd.f32 %v384_v51, %v383_v48 }
  0xfe   : > { %v387_v57 = vadd.f32 %v386_v54, %v385_v53  ;;  %v414_v58 = vadd.f32 %v413_v56, %v412_v52 }
 0x100   : > { %v389_v61 = vadd.f32 %v388_v60, %v387_v57  ;;  %v416_v62 = vadd.f32 %v415_v59, %v414_v58 }
 0x102   : > { %v390_v0 = vrot.slane %v389_v61, 4  ;;  %v418_v1 = vadd.f32 %v417_v63, %v416_v62 }
 0x104   : > { %v391_v2 = vadd.f32 %v390_v0, %v389_v61  ;;  %v419_v3 = vrot.slane %v418_v1, 4 }
 0x106   : > { %v392_v4 = vrot.slane %v391_v2, 2  ;;  %v420_v5 = vadd.f32 %v419_v3, %v418_v1 }
 0x108   : > { %v393_v6 = vadd.f32 %v392_v4, %v391_v2  ;;  %v421_v7 = vrot.slane %v420_v5, 2 }
 0x10a   : > { %v394_v8 = vrot.slane %v393_v6, 1  ;;  %v422_v9 = vadd.f32 %v421_v7, %v420_v5 }
 0x10c   : > { %v423_v10 = vrot.slane %v422_v9, 1  ;;  %v395_v11 = vadd.f32 %v394_v8, %v393_v6 }
 0x10e   : > { %v424_v12 = vadd.f32 %v423_v10, %v422_v9 }
 0x110   : > { %v426_v13 = vsel %vm425_vm3, %v395_v11, %v424_v12 }
 0x111   : > { %428 = vst.msk [vmem:[%s211_s17] sm:$0x3] %vm427_vm4, %v426_v13 }
 0x112 PF: > { %s15_s15 = sadd.s32 1, %s604_s15  }
 0x113   : > { %p12_p5 = scmp.ge.s32.totalorder %s15_s15, 4  }
 0x115   :  { %14 = sbr.rel (!%p12_p5) target bundleno = 1 (0x1), region = 74 }

// kernel: bottleneck_forward.9
= control target key start
LH: loop header
LB: loop body
LE: loop exit
PB: predicated region body
PF: predicated region fallthrough
CT: control target
= control target key end

     0   :  { %s522_s21 = smov 0   ;;  %s637_s0 = inlined_call_operand.vmem [shape: f32[128,8], index: 0, kind: input, shape index: {}]   ;;  %s638_s1 = inlined_call_operand.vmem [shape: f32[1,8], index: 1, kind: input, shape index: {}]   ;;  %s639_s2 = inlined_call_operand.vmem [shape: f32[1,8], index: 2, kind: input, shape index: {}]   ;;  %s640_s3 = inlined_call_operand.vmem [shape: f32[128,8], index: 3, kind: input, shape index: {}]   ;;  %s641_s4 = inlined_call_operand.vmem [shape: f32[1,8], index: 4, kind: input, shape index: {}]   ;;  %s642_s5 = inlined_call_operand.vmem [shape: f32[1,8], index: 5, kind: input, shape index: {}]   ;;  %s643_s6 = inlined_call_operand.vmem [shape: f32[128,8], index: 6, kind: output, shape index: {}]  }
   0x1 LB: > { %s454_s22 = sadd.s32 4294967295, %s485_s21   ;;  %p458_p0 = scmp.ge.s32.totalorder %s485_s21, 1  ;;  %s485_s21 = sphi %s522_s21, %s16_s21  }
   0x2   : > { %p224_p1 = scmp.lt.s32.totalorder %s485_s21, 3 }
   0x4   : > { %p225_p2 = pnand %p458_p0, %p224_p1 }
   0x5   : > { %s459_s23 = sshll.u32 (!%p225_p2), %s454_s22, 3  ;;  %v535_v0 = vld [vmem:[%s638_s1] ss:$0 sm:$0xff] (!%p225_p2)  ;;  %vm377_vm0 = vcmask (!%p225_p2), 64512  }
   0x6   : > { %228 = sbr.rel (%p225_p2) target bundleno = 38 (0x26), region = 44  ;;  %p260_p3 = scmp.lt.s32.totalorder (!%p225_p2), %s459_s23, 15  ;;  %v540_v1 = vld [vmem:[%s641_s4] ss:$0 sm:$0xff] (!%p225_p2) }
   0x7   : > { %v557_v2 = vld [vmem:[%s639_s2] ss:$0 sm:$0xff] (!%p225_p2) }
   0x8   : > { %v562_v3 = vld [vmem:[%s642_s5] ss:$0 sm:$0xff] (!%p225_p2) }
   0xd   : > { %s645_s23 = smov (!%p260_p3, %s459_s23), 15 }
   0xe   : > { %s530_s24 = sshll.u32 %s645_s23, 3 }
   0xf   : > { %s546_s7 = scalar_lea.vmem %s637_s0, %s530_s24  ;;  %s552_s10 = scalar_lea.vmem %s640_s3, %s530_s24 }
  0x10   : > { %v277_v4 = vld [vmem:[%s546_s7] sm:$0xff]  ;;  %v278_v6 = vld [vmem:[%s546_s7 + $0x8] sm:$0xff]  ;;  %v279_v11 = vld [vmem:[%s546_s7 + $0x10] sm:$0xff]  ;;  %s601_s17 = scalar_lea.vmem %s643_s6, %s530_s24 }
  0x11   : > { %v323_v5 = vld [vmem:[%s552_s10] sm:$0xff]  ;;  %v292_v7 = vmul.f32 %v535_v0, %v277_v4  ;;  %v293_v9 = vmul.f32 %v535_v0, %v278_v6  ;;  %v324_v10 = vld [vmem:[%s552_s10 + $0x8] sm:$0xff]  ;;  %v325_v12 = vld [vmem:[%s552_s10 + $0x10] sm:$0xff]  ;;  %v294_v14 = vmul.f32 %v535_v0, %v279_v11 }
  0x12   : > { %v338_v8 = vmul.f32 %v540_v1, %v323_v5  ;;  %v339_v13 = vmul.f32 %v540_v1, %v324_v10  ;;  %v340_v15 = vmul.f32 %v540_v1, %v325_v12  ;;  %v280_v16 = vld [vmem:[%s546_s7 + $0x18] sm:$0xff]  ;;  %v281_v18 = vld [vmem:[%s546_s7 + $0x20] sm:$0xff]  ;;  %v282_v24 = vld [vmem:[%s546_s7 + $0x28] sm:$0xff] }
  0x13   : > { %v326_v17 = vld [vmem:[%s552_s10 + $0x18] sm:$0xff]  ;;  %v307_v19 = vadd.f32 %v557_v2, %v292_v7  ;;  %v308_v21 = vadd.f32 %v557_v2, %v293_v9  ;;  %v295_v22 = vmul.f32 %v535_v0, %v280_v16  ;;  %v327_v23 = vld [vmem:[%s552_s10 + $0x20] sm:$0xff]  ;;  %v309_v26 = vadd.f32 %v557_v2, %v294_v14  ;;  %v328_v33 = vld [vmem:[%s552_s10 + $0x28] sm:$0xff] }
  0x14   : > { %v353_v20 = vadd.f32 %v562_v3, %v338_v8  ;;  %v354_v25 = vadd.f32 %v562_v3, %v339_v13  ;;  %v355_v27 = vadd.f32 %v562_v3, %v340_v15  ;;  %v341_v28 = vmul.f32 %v540_v1, %v326_v17  ;;  %v283_v42 = vld [vmem:[%s546_s7 + $0x30] sm:$0xff]  ;;  %v284_v48 = vld [vmem:[%s546_s7 + $0x38] sm:$0xff] }
  0x15   : > { %v315_v29 = vmax.f32 %v307_v19, 0.0  ;;  %v316_v30 = vmax.f32 %v308_v21, 0.0  ;;  %v310_v31 = vadd.f32 %v557_v2, %v295_v22  ;;  %v296_v32 = vmul.f32 %v535_v0, %v281_v18  ;;  %v329_v47 = vld [vmem:[%s552_s10 + $0x30] sm:$0xff]  ;;  %v330_v53 = vld [vmem:[%s552_s10 + $0x38] sm:$0xff] }
  0x16   : > { %v317_v34 = vmax.f32 %v309_v26, 0.0  ;;  %v356_v35 = vadd.f32 %v562_v3, %v341_v28  ;;  %v342_v36 = vmul.f32 %v540_v1, %v327_v23  ;;  %v297_v37 = vmul.f32 %v535_v0, %v282_v24 }
  0x17   : > { %v361_v38 = vadd.f32 %v353_v20, %v315_v29  ;;  %v362_v39 = vadd.f32 %v354_v25, %v316_v30  ;;  %v318_v40 = vmax.f32 %v310_v31, 0.0  ;;  %v311_v41 = vadd.f32 %v557_v2, %v296_v32 }
  0x18   : > { %v363_v43 = vadd.f32 %v355_v27, %v317_v34  ;;  %v357_v44 = vadd.f32 %v562_v3, %v342_v36  ;;  %v312_v45 = vadd.f32 %v557_v2, %v297_v37  ;;  %v343_v46 = vmul.f32 %v540_v1, %v328_v33 }
  0x19   : > { %v369_v49 = vmax.f32 %v361_v38, 0.0  ;;  %v370_v50 = vmax.f32 %v362_v39, 0.0  ;;  %v364_v51 = vadd.f32 %v356_v35, %v318_v40  ;;  %v319_v52 = vmax.f32 %v311_v41, 0.0 }
  0x1a   : > { %v371_v54 = vmax.f32 %v363_v43, 0.0  ;;  %v320_v55 = vmax.f32 %v312_v45, 0.0  ;;  %v358_v56 = vadd.f32 %v562_v3, %v343_v46  ;;  %v298_v57 = vmul.f32 %v535_v0, %v283_v42 }
  0x1b   : > { %378 = vst.msk [vmem:[%s601_s17] sm:$0xff] %vm377_vm0, %v369_v49  ;;  %379 = vst.msk [vmem:[%s601_s17 + $0x8] sm:$0xff] %vm377_vm0, %v370_v50  ;;  %v372_v58 = vmax.f32 %v364_v51, 0.0  ;;  %v365_v59 = vadd.f32 %v357_v44, %v319_v52  ;;  %v344_v60 = vmul.f32 %v540_v1, %v329_v47  ;;  %v299_v61 = vmul.f32 %v535_v0, %v284_v48 }
  0x1c   : > { %380 = vst.msk [vmem:[%s601_s17 + $0x10] sm:$0xff] %vm377_vm0, %v371_v54  ;;  %v366_v62 = vadd.f32 %v358_v56, %v320_v55  ;;  %v313_v63 = vadd.f32 %v557_v2, %v298_v57  ;;  %v345_v4 = vmul.f32 %v540_v1, %v330_v53 }
  0x1d   : > { %381 = vst.msk [vmem:[%s601_s17 + $0x18] sm:$0xff] %vm377_vm0, %v372_v58  ;;  %v373_v5 = vmax.f32 %v365_v59, 0.0  ;;  %v359_v6 = vadd.f32 %v562_v3, %v344_v60  ;;  %v314_v7 = vadd.f32 %v557_v2, %v299_v61 }
  0x1e   : > { %v374_v8 = vmax.f32 %v366_v62, 0.0  ;;  %v321_v9 = vmax.f32 %v313_v63, 0.0  ;;  %v360_v0 = vadd.f32 %v562_v3, %v345_v4 }
  0x1f   : > { %382 = vst.msk [vmem:[%s601_s17 + $0x20] sm:$0xff] %vm377_vm0, %v373_v5  ;;  %v322_v10 = vmax.f32 %v314_v7, 0.0 }
  0x20   : > { %383 = vst.msk [vmem:[%s601_s17 + $0x28] sm:$0xff] %vm377_vm0, %v374_v8  ;;  %v367_v11 = vadd.f32 %v359_v6, %v321_v9 }
  0x21   : > { %v368_v12 = vadd.f32 %v360_v0, %v322_v10 }
  0x22   : > { %v375_v1 = vmax.f32 %v367_v11, 0.0 }
  0x23   : > { %v376_v13 = vmax.f32 %v368_v12, 0.0 }
  0x24   : > { %384 = vst.msk [vmem:[%s601_s17 + $0x30] sm:$0xff] %vm377_vm0, %v375_v1 }
  0x25   : > { %385 = vst.msk [vmem:[%s601_s17 + $0x38] sm:$0xff] %vm377_vm0, %v376_v13 }
  0x26 PF: > { %s16_s21 = sadd.s32 1, %s485_s21  }
  0x27   : > { %p13_p4 = scmp.ge.s32.totalorder %s16_s21, 4  }
  0x29   :  { %15 = sbr.rel (!%p13_p4) target bundleno = 1 (0x1), region = 77 }

</bundles_post_ra>
